<compile_context>
chip_gen: v6e
topology: v6e:2x2x1
jax: 0.10.0
libtpu: 0.0.40
codegen_flags: <defaults>
</compile_context>

<pallas_src>
import functools
import random

import jax
import jax.numpy as jnp
from jax import lax
from jax.experimental import pallas as pl
from jax.experimental.pallas import tpu as pltpu


# ----------------------------------------------------------------------------
# Pass 1: per-(B, C) spatial mean + unbiased variance, packed as (B, C, 2)
# ----------------------------------------------------------------------------
def _stats_kernel(x_ref, stats_ref, sum_ref, ssq_ref, *, hw, thw, n_hw):
    # x_ref: (1, TC, THW)   stats_ref: (1, TC, 2)   scratch: (1, TC, 1) f32
    if n_hw == 1:
        # Whole spatial extent in one block: centered (numerically nicer) form.
        x = x_ref[...].astype(jnp.float32)
        mu = jnp.mean(x, axis=-1, keepdims=True)
        xc = x - mu
        # Unbiased variance (torch.var default). hw == 1 -> inf/nan, like torch.
        var = jnp.sum(xc * xc, axis=-1, keepdims=True) / (hw - 1)
        stats_ref[:, :, 0:1] = mu
        stats_ref[:, :, 1:2] = var
    else:
        hwi = pl.program_id(2)

        @pl.when(hwi == 0)
        def _():
            sum_ref[...] = jnp.zeros_like(sum_ref)
            ssq_ref[...] = jnp.zeros_like(ssq_ref)

        x = x_ref[...].astype(jnp.float32)
        if hw % thw != 0:
            # Padded last spatial tile: mask padded lanes out of the sums.
            lane = lax.broadcasted_iota(jnp.int32, x.shape, 2) + hwi * thw
            x = jnp.where(lane < hw, x, 0.0)
        sum_ref[...] += jnp.sum(x, axis=-1, keepdims=True)
        ssq_ref[...] += jnp.sum(x * x, axis=-1, keepdims=True)

        @pl.when(hwi == pl.num_programs(2) - 1)
        def _():
            mu = sum_ref[...] * (1.0 / hw)
            var = (ssq_ref[...] - hw * mu * mu) / (hw - 1)
            var = jnp.maximum(var, 0.0)  # guard fp rounding of the ssq form
            stats_ref[:, :, 0:1] = mu
            stats_ref[:, :, 1:2] = var


# ----------------------------------------------------------------------------
# Pass 2: single broadcast FMA per element with precomputed scale / shift
# ----------------------------------------------------------------------------
def _apply_kernel(x_ref, ss_ref, o_ref, *, compute_dtype):
    ss = ss_ref[...]                                   # (1, TC, 2) f32
    scale = ss[:, :, 0:1].astype(compute_dtype)
    shift = ss[:, :, 1:2].astype(compute_dtype)
    x = x_ref[...].astype(compute_dtype)               # (1, TC, THW)
    o_ref[...] = (x * scale + shift).astype(o_ref.dtype)


# ----------------------------------------------------------------------------
# Tiling helpers
# ----------------------------------------------------------------------------
def _vmem_capacity_bytes():
    try:
        info = pltpu.get_tpu_info()
        cap = getattr(info, "vmem_capacity_bytes", None)
        if cap:
            return int(cap)
    except Exception:
        pass
    return 64 << 20  # conservative (v7x-sized) default


def _pick_tile(C, HW, per_elem_bytes, budget):
    """Choose (TC, THW) so TC*THW*per_elem_bytes <= budget.

    Block legality: TC is either C (full dim) or a multiple of 8; THW is
    either HW (full dim) or a multiple of 128."""
    max_elems = max(1, budget // per_elem_bytes)
    if HW <= max_elems:
        max_tc = max_elems // HW
        if max_tc >= C:
            return C, HW
        if max_tc >= 8:
            return int((max_tc // 8) * 8), HW
    # Large feature map: tile the spatial axis in multiples of 128.
    tc = C if C < 8 else 8
    max_thw = max(1, max_elems // tc)
    if max_thw >= HW:
        return tc, HW
    thw = max(128, (max_thw // 128) * 128)
    return tc, min(thw, HW)


# ----------------------------------------------------------------------------
# Wrapper
# ----------------------------------------------------------------------------
def diverse_style_pallas(x, perm, eps=1e-6, _tiles=None):
    """Normalize x[b,c] by its own spatial stats, re-style with x[perm[b],c] stats.

    x:    (B, C, H, W)
    perm: (B,) int permutation of batch indices
    _tiles: optional (TC, THW) override (testing only).
    """
    B, C, H, W = x.shape
    HW = H * W
    x_flat = x.reshape(B, C, HW)
    isz = jnp.dtype(x.dtype).itemsize

    # Elementwise compute dtype: bf16 math for bf16 inputs (v6e/v7x bf16 VALUs,
    # halves vreg/VMEM pressure; also matches torch bf16-native numerics);
    # f32 everywhere else.
    compute_dtype = jnp.bfloat16 if x.dtype == jnp.bfloat16 else jnp.float32
    c_isz = jnp.dtype(compute_dtype).itemsize

    vmem_cap = _vmem_capacity_bytes()
    vmem_limit = min(64 << 20, (vmem_cap * 3) // 4)   # 64 MiB v5e/v6e, 48 MiB v7x
    block_budget = min(32 << 20, vmem_limit // 2)     # 32 MiB v5e/v6e, 24 MiB v7x

    if _tiles is not None:
        tc_s, thw_s = _tiles
        tc_a, thw_a = _tiles
    else:
        # Stats pass: 2x double-buffered input block + ~2 f32 temporaries.
        tc_s, thw_s = _pick_tile(C, HW, per_elem_bytes=2 * isz + 8,
                                 budget=block_budget)
        # Apply pass: 2x(in) + 2x(out) double-buffered + ~2 compute-dtype temps.
        tc_a, thw_a = _pick_tile(C, HW, per_elem_bytes=4 * isz + 2 * c_isz,
                                 budget=block_budget)
        # v7x megacore: avoid a single-step "parallel" grid leaving one TC idle.
        if B == 1 and C >= 16:
            half = max(8, ((C // 2) + 7) // 8 * 8)
            if half < C:
                tc_s = min(tc_s, half)
                tc_a = min(tc_a, half)

    n_ct_s, n_hw_s = pl.cdiv(C, tc_s), pl.cdiv(HW, thw_s)
    n_ct_a, n_hw_a = pl.cdiv(C, tc_a), pl.cdiv(HW, thw_a)

    # --- Pass 1: packed (mu, var) stats --------------------------------------
    stats_cost = pl.CostEstimate(
        flops=3 * B * C * HW,
        transcendentals=0,
        bytes_accessed=B * C * HW * isz + B * C * 2 * 4,
    )
    stats = pl.pallas_call(
        functools.partial(_stats_kernel, hw=HW, thw=thw_s, n_hw=n_hw_s),
        out_shape=jax.ShapeDtypeStruct((B, C, 2), jnp.float32),
        grid=(B, n_ct_s, n_hw_s),
        in_specs=[pl.BlockSpec((1, tc_s, thw_s), lambda b, ct, hi: (b, ct, hi))],
        out_specs=pl.BlockSpec((1, tc_s, 2), lambda b, ct, hi: (b, ct, 0)),
        scratch_shapes=[pltpu.VMEM((1, tc_s, 1), jnp.float32),
                        pltpu.VMEM((1, tc_s, 1), jnp.float32)],
        compiler_params=pltpu.CompilerParams(
            dimension_semantics=("parallel", "parallel", "arbitrary"),
            vmem_limit_bytes=vmem_limit),
        cost_estimate=stats_cost,
    )(x_flat)

    # --- Glue (plain JAX, tiny): permuted gather + fold sqrt/rsqrt -----------
    mu = stats[:, :, 0]                                # (B, C) f32
    var = stats[:, :, 1]
    scale = jnp.sqrt(var[perm] + eps) * lax.rsqrt(var + eps)
    shift = mu[perm] - mu * scale
    ss = jnp.stack([scale, shift], axis=-1)            # (B, C, 2) f32

    # --- Pass 2: streamed per-channel affine ---------------------------------
    apply_cost = pl.CostEstimate(
        flops=2 * B * C * HW,
        transcendentals=0,
        bytes_accessed=2 * B * C * HW * isz + B * C * 2 * 4,
    )
    out_flat = pl.pallas_call(
        functools.partial(_apply_kernel, compute_dtype=compute_dtype),
        out_shape=jax.ShapeDtypeStruct((B, C, HW), x.dtype),
        grid=(B, n_ct_a, n_hw_a),
        in_specs=[pl.BlockSpec((1, tc_a, thw_a), lambda b, ct, hi: (b, ct, hi)),
                  pl.BlockSpec((1, tc_a, 2), lambda b, ct, hi: (b, ct, 0))],
        out_specs=pl.BlockSpec((1, tc_a, thw_a), lambda b, ct, hi: (b, ct, hi)),
        compiler_params=pltpu.CompilerParams(
            dimension_semantics=("parallel", "parallel", "parallel"),
            vmem_limit_bytes=vmem_limit),
        cost_estimate=apply_cost,
    )(x_flat, ss)

    return out_flat.reshape(B, C, H, W)


# ----------------------------------------------------------------------------
# Module-level port
# ----------------------------------------------------------------------------
class DiverseStyleJax:
    """JAX/Pallas port of DiverseStyle. No learnable parameters."""

    def __init__(self, p=0.5, eps=1e-6):
        self.p = p
        self.eps = eps
        self.training = True

    def __call__(self, x, key):
        if not self.training:
            return x
        # Host-side stochastic gate, exactly like `if random.random() > self.p`
        # in the torch module. Not jit-traceable by design (matches the spec).
        if random.random() > self.p:
            return x
        B = x.shape[0]
        perm = jax.random.permutation(key, B).astype(jnp.int32)
        return diverse_style_pallas(x, perm, eps=self.eps)


# ----------------------------------------------------------------------------
# Reference + self-test
# ----------------------------------------------------------------------------
def _reference(x, perm, eps=1e-6):
    mu = jnp.mean(x, axis=(2, 3), keepdims=True)
    var = jnp.var(x, axis=(2, 3), keepdims=True, ddof=1)  # torch.var is unbiased
    sig = jnp.sqrt(var + eps)
    x_normed = (x - mu) / sig
    return x_normed * sig[perm] + mu[perm]


if __name__ == "__main__":
    random.seed(0)
    key = jax.random.PRNGKey(0)
    kx, k2, kmod = jax.random.split(key, 3)

    # --- main shape from the module spec -------------------------------------
    B, C, H, W = 2, 4, 16, 16
    x = jax.random.normal(kx, (B, C, H, W), dtype=jnp.float32) * 2.0 + 0.5
    perm = jnp.array([1, 0], dtype=jnp.int32)
    out = jax.block_until_ready(diverse_style_pallas(x, perm, eps=1e-6))
    ref = _reference(x, perm, eps=1e-6)
    assert out.shape == x.shape and out.dtype == x.dtype
    assert jnp.allclose(out, ref, atol=1e-4, rtol=1e-4), "mismatch vs reference"

    # --- exercise channel tiling + HW-tile accumulation (padded last tile) ---
    B2, C2, H2, W2 = 2, 16, 16, 20     # HW = 320 = 2*128 + 64 -> masked tile
    x2 = jax.random.normal(k2, (B2, C2, H2, W2), dtype=jnp.float32) * 1.5 - 0.3
    perm2 = jnp.array([1, 0], dtype=jnp.int32)
    out2 = jax.block_until_ready(
        diverse_style_pallas(x2, perm2, eps=1e-6, _tiles=(8, 128)))
    ref2 = _reference(x2, perm2, eps=1e-6)
    assert jnp.allclose(out2, ref2, atol=2e-4, rtol=2e-4), "tiled-path mismatch"

    # Also exercise the full module path (stochastic gate + random perm).
    mod = DiverseStyleJax(p=0.5, eps=1e-6)
    y = jax.block_until_ready(mod(x, kmod))
    assert y.shape == x.shape

    print("KERNEL_OK")
</pallas_src>

<mosaic_0001>
module attributes {stable_mosaic.version = 11 : i64} {
  func.func @_stats_kernel(%arg0: i32, %arg1: i32, %arg2: i32, %arg3: memref<1x4x256xf32, #tpu.memory_space<vmem>>, %arg4: memref<1x4x2xf32, #tpu.memory_space<vmem>>, %arg5: memref<1x4x1xf32, #tpu.memory_space<vmem>>, %arg6: memref<1x4x1xf32, #tpu.memory_space<vmem>>) attributes {dimension_semantics = [#tpu.dimension_semantics<parallel>, #tpu.dimension_semantics<parallel>, #tpu.dimension_semantics<arbitrary>], iteration_bounds = array<i64: 2, 1, 1>, scalar_prefetch = 0 : i64, scratch_operands = 2 : i64, tpu.core_type = #tpu.core_type<tc>, window_params = [{transform_indices = @transform_0, window_bounds = array<i64: 1, 4, 256>}, {transform_indices = @transform_1, window_bounds = array<i64: 1, 4, 2>}]} {
    %c0 = arith.constant 0 : index
    %c0_0 = arith.constant 0 : index
    %c0_1 = arith.constant 0 : index
    %0 = vector.load %arg3[%c0, %c0_0, %c0_1] : memref<1x4x256xf32, #tpu.memory_space<vmem>>, vector<1x4x256xf32>
    %cst = arith.constant dense<0.000000e+00> : vector<1x4xf32>
    %1 = vector.multi_reduction <add>, %0, %cst [2] : vector<1x4x256xf32> to vector<1x4xf32>
    %2 = vector.shape_cast %1 : vector<1x4xf32> to vector<1x4x1xf32>
    %cst_2 = arith.constant 2.560000e+02 : f32
    %3 = vector.broadcast %cst_2 : f32 to vector<1x4x1xf32>
    %4 = arith.divf %2, %3 : vector<1x4x1xf32>
    %5 = vector.broadcast %4 : vector<1x4x1xf32> to vector<1x4x256xf32>
    %6 = arith.subf %0, %5 : vector<1x4x256xf32>
    %7 = arith.mulf %6, %6 : vector<1x4x256xf32>
    %cst_3 = arith.constant dense<0.000000e+00> : vector<1x4xf32>
    %8 = vector.multi_reduction <add>, %7, %cst_3 [2] : vector<1x4x256xf32> to vector<1x4xf32>
    %9 = vector.shape_cast %8 : vector<1x4xf32> to vector<1x4x1xf32>
    %cst_4 = arith.constant 2.550000e+02 : f32
    %10 = vector.broadcast %cst_4 : f32 to vector<1x4x1xf32>
    %11 = arith.divf %9, %10 : vector<1x4x1xf32>
    %c0_5 = arith.constant 0 : index
    %c0_6 = arith.constant 0 : index
    %c0_7 = arith.constant 0 : index
    %12 = vector.load %arg4[%c0_5, %c0_6, %c0_7] : memref<1x4x2xf32, #tpu.memory_space<vmem>>, vector<1x4x1xf32>
    tpu.vector_store %arg4[%c0_5, %c0_6, %c0_7], %4 {strides = array<i32>} : memref<1x4x2xf32, #tpu.memory_space<vmem>>, vector<1x4x1xf32>,
    %c0_8 = arith.constant 0 : index
    %c0_9 = arith.constant 0 : index
    %c1 = arith.constant 1 : index
    %13 = vector.load %arg4[%c0_8, %c0_9, %c1] : memref<1x4x2xf32, #tpu.memory_space<vmem>>, vector<1x4x1xf32>
    tpu.vector_store %arg4[%c0_8, %c0_9, %c1], %11 {strides = array<i32>} : memref<1x4x2xf32, #tpu.memory_space<vmem>>, vector<1x4x1xf32>,
    return
  }
  func.func @transform_0(%arg0: i32, %arg1: i32, %arg2: i32) -> (i32, i32, i32) {
    %c0_i32 = arith.constant 0 : i32
    return %arg0, %arg1, %arg2 : i32, i32, i32
  }
  func.func @transform_1(%arg0: i32, %arg1: i32, %arg2: i32) -> (i32, i32, i32) {
    %c0_i32 = arith.constant 0 : i32
    %c0_i32_0 = arith.constant 0 : i32
    return %arg0, %arg1, %c0_i32 : i32, i32, i32
  }
}

</mosaic_0001>

<bundles_post_ra>
// kernel: tpu_custom_call.1
= control target key start
LH: loop header
LB: loop body
LE: loop exit
PB: predicated region body
PF: predicated region fallthrough
CT: control target
= control target key end

     0   :  { %6 = vsyncpa [#allocation5], 0  ;;  %s560_s0 = inlined_call_operand.hbm [shape: f32[2,4,256], index: 0, kind: input, shape index: {}]   ;;  %s561_s1 = inlined_call_operand.vmem [shape: f32[2,4,2], index: 1, kind: output, shape index: {}]  }
   0x1   :  { %8 = vsyncpa [#allocation5 + $0x1], 0  ;;  %s456_s6 = smov 0   ;;  %s458_s7 = smov 0  }
   0x2   :  { %s460_s8 = smov 0   ;;  %s462_s9 = smov 0  }
   0x3   :  { %s464_s10 = smov 0   ;;  %s466_s11 = smov 0  }
   0x4 LB: > { %s294_s12 = sadd.s32 4294967295, %s442_s11   ;;  %s33_s13 = sadd.s32 1, %s438_s10  ;;  %s442_s11 = sphi %s466_s11, %s14_s11   ;;  %s438_s10 = sphi %s464_s10, %s569_s10   ;;  %s434_s9 = sphi %s462_s9, %s568_s9   ;;  %s430_s8 = sphi %s460_s8, %s567_s8   ;;  %s426_s7 = sphi %s458_s7, %s566_s7   ;;  %s422_s6 = sphi %s456_s6, %s565_s6  }
   0x5   : > { %p35_p0 = scmp.ge.s32.totalorder %s33_s13, 2  ;;  %s44_s14 = sadd.s32 1, %s430_s8 }
   0x6   : > { %p51_p1 = scmp.ne.s32.totalorder %s430_s8, %s426_s7  ;;  %p52_p2 = scmp.eq.s32.totalorder %s442_s11, 0 }
   0x7   : > { %s571_s13 = smov (%p35_p0, %s33_s13), 0  ;;  %p57_p4 = scmp.ne.s32.totalorder %s426_s7, %s422_s6 }
   0x8   : > { %p492_p3 = por %p52_p2, %p51_p1  ;;  %s37_s16 = ssub.s32 %s438_s10, %s571_s13 }
   0x9   : > { %p58_p5 = scmp.eq.s32.totalorder %s294_s12, 0  ;;  %p42_p6 = scmp.eq.s32.totalorder %s37_s16, 0 }
   0xa   : > { %p313_p8 = scmp.lt.s32.totalorder %s442_s11, 2  ;;  %s109_s19 = sand.u32 1, %s430_s8  }
   0xb   : > { %p499_p7 = por %p58_p5, %p57_p4  ;;  %s306_s20 = sshll.u32 %s438_s10, 7 }
   0xc   : > { %s505_s18 = scalar_select %p42_p6, %s430_s8, %s44_s14  }
   0xd   : > { %s298_s21 = sshll.u32 %s109_s19, 3  ;;  %s123_s24 = scalar_lea.hbm %s560_s0, %s306_s20 }
   0xe   : > { %s113_s25 = scalar_lea.vmem [#allocation4], %s298_s21  ;;  %p514_p9 = pnand %p313_p8, %p492_p3 }
   0xf   : > { %s125_s26 = sshll.u32 %s113_s25, 4  ;;  %p301_p10 = scmp.ge.s32.totalorder %s442_s11, 1  ;;  %s126_s26 = int_to_ptr.vmem [resolvable:$true] %s125_s26 }
  0x10   : > { %p130_p11 = scmp.lt.s32.totalorder %s442_s11, 3  ;;  %s110_s28 = scalar_lea.sflag [#allocation5], %s109_s19 }
  0x11   : > { %p366_p12 = pneg %p514_p9  ;;  %s377_s29 = scalar_lea.vmem %s126_s26, 128 }
  0x12   : > { %p378_p13 = scmp.ne.s32.totalorder %s126_s26, %s377_s29  ;;  %s444_s30 = smov [#allocation4]  }
  0x13   : > { %s382_s2 = sshll.u32 %s444_s30, 4  ;;  %s383_s2 = int_to_ptr.vmem [resolvable:$false] %s382_s2 }
  0x14   : > { %p380_p0 = pnand %p378_p13, %p366_p12  ;;  %s384_s3 = scalar_lea.vmem %s383_s2, 256 }
  0x15   : > { %p385_p2 = scmp.lt.s32.totalorder %s126_s26, %s383_s2  ;;  %p386_p3 = scmp.lt.s32.totalorder %s384_s3, %s377_s29 }
  0x16   : > { %p381_p1 = pneg %p380_p0 }
  0x17   : > { %p387_p4 = por %p386_p3, %p385_p2 }
  0x19   : > { %p388_p5 = pnand %p387_p4, %p381_p1 }
  0x1b   : > { %391 = shalt.err (!%p388_p5)
}
  0x1c   : > { %312 = dma.hbm_to_vmem [thread:$0]  (!%p514_p9), %s123_s24, 128, %s126_s26, %s110_s28  }
  0x1d   : > { %p131_p6 = pnand %p301_p10, %p130_p11 }
  0x1e   : > { %s136_s4 = sand.u32 (!%p131_p6), 1, %s426_s7  }
  0x1f   : > { %134 = sbr.rel (%p131_p6) target bundleno = 335 (0x14f), region = 24  ;;  %s302_s5 = sshll.u32 (!%p131_p6), %s136_s4, 3 }
  0x20   : > { %s137_s6 = scalar_lea.sflag (!%p131_p6), [#allocation5], %s136_s4  ;;  %s140_s12 = scalar_lea.vmem (!%p131_p6), [#allocation4], %s302_s5 }
  0x24   : > { %417 = dma.done.wait (%p499_p7), %s137_s6, 128  }
  0x25   : > { %419 = vsyncadd (%p499_p7), %s137_s6, 4294967168  ;;  %vm173_vm0 = vcmask 1043456   ;;  %v169_v0 = vld [vmem:[%s140_s12] sm:$0xff]  ;;  %p162_p8 = scmp.lt.s32.totalorder %s434_s9, 1  ;;  %v445_v5 = vmov 839922192   ;;  %v185_v7 = vlaneseq }
  0x26   : > { %v171_v1 = vcombine.high %v169_v0, %v169_v0  ;;  %v174_v2 = vsel %vm173_vm0, %v169_v0, 0.0  ;;  %v183_v6 = vunpack.c.l.s4 %v445_v5  ;;  %vm202_vm1 = vcmask 3072  }
  0x27   : > { %s573_s9 = smov (!%p162_p8, %s434_s9), 1  ;;  %v186_v9 = vshrl.u32 %v185_v7, 7  ;;  %vm204_vm2 = vcmask 11272  }
  0x28   : > { %v175_v3 = vsel %vm173_vm0, %v171_v1, 0.0  ;;  %v184_v8 = vunpack.c.0.s8 %v183_v6  ;;  %s303_s14 = sshll.u32 %s573_s9, 2 }
  0x29   : > { %v176_v4 = vadd.f32 %v175_v3, %v174_v2  ;;  %s168_s17 = scalar_lea.vmem %s561_s1, %s303_s14 }
  0x2a   : > { %v187_v10 = vsub.s32 %v184_v8, %v186_v9 }
  0x2b   : > { %177 = vadd.xlane.f32.xlu0 %v176_v4 }
  0xb4   : > { %v178_v11 = vpop.xlane.xlu0 %177 }
  0xb5   : > { %v180_v12 = vmul.f32 0.00390625, %v178_v11 }
  0xb7   : > { %v188_v13 = vrot.slane %v180_v12, %v187_v10  ;;  %203 = vst.msk [vmem:[%s168_s17] sm:$0xf] %vm202_vm1, %v180_v12 }
  0xb9   : > { %v190_v14 = vsub.f32 %v169_v0, %v188_v13 }
  0xbb   : > { %v191_v15 = vmul.f32 %v190_v14, %v190_v14 }
  0xbd   : > { %v193_v16 = vcombine.high %v191_v15, %v191_v15  ;;  %v195_v17 = vsel %vm173_vm0, %v191_v15, 0.0 }
  0xbf   : > { %v196_v18 = vsel %vm173_vm0, %v193_v16, 0.0 }
  0xc0   : > { %v197_v19 = vadd.f32 %v196_v18, %v195_v17 }
  0xc2   : > { %198 = vadd.xlane.f32.xlu0 %v197_v19 }
 0x14b   : > { %v199_v20 = vpop.xlane.xlu0 %198 }
 0x14c   : > { %v201_v21 = vmul.f32 0.003921569, %v199_v20 }
 0x14e   : > { %205 = vst.msk [vmem:[%s168_s17] sm:$0xf] %vm204_vm2, %v201_v21 }
 0x14f PF: > { %s14_s11 = sadd.s32 1, %s442_s11   ;;  %s565_s6 = smov %s426_s7 }
 0x150   : > { %p11_p7 = scmp.ge.s32.totalorder %s14_s11, 4   ;;  %s566_s7 = smov %s430_s8 }
 0x151   : > { %s567_s8 = smov %s505_s18  ;;  %s568_s9 = smov %s438_s10 }
 0x152   : > { %s569_s10 = smov %s571_s13  ;;  %13 = sbr.rel (!%p11_p7) target bundleno = 4 (0x4), region = 64 }
 0x157   :  { %231 = vsyncpa [#allocation5], 1 }
 0x158   :  { %233 = vsyncpa [#allocation5 + $0x1], 1 }

</bundles_post_ra>
